<compile_context>
chip_gen: v7x
topology: tpu7x:2x2x1
jax: 0.10.0
libtpu: 0.0.40
codegen_flags: <defaults>
</compile_context>

<pallas_src>
import jax
import jax.numpy as jnp
from jax.experimental import pallas as pl
from jax.experimental.pallas import tpu as pltpu

# ---- Hyperparameters mirroring `params.*` from the PyTorch script ----
MAX_EDGE = 7                   # params.maxEdge
S = MAX_EDGE + 1               # servers per row = 8
HIDDEN = 32                    # params.hidden_dim
NUM_HEADS = 4
CONV_OUT = 16
UNITS = CONV_OUT * S           # 128 (key/value dim of the attention)
ACT = 8                        # act_shape
OBS = 2 * S + 4                # 20
FUSED = UNITS + HIDDEN         # 160 = width of fused [x | task_embed] activation
N_BIAS_ROWS = 9
LN_EPS = 1e-5                  # PyTorch LayerNorm default
TB_MAX = 2048                  # max batch rows per grid block (multiple of 8)

# ---- Weight-slab row layout (all section starts are multiples of 8) ----
R_WIN = 0                          # [OBS,   FUSED]   fused conv-as-matmul | task_fc
R_WC = 24                          # [FUSED, HIDDEN]  [Wv@Wo@W1 ; W1] (attention folded into fc1)
R_W2 = R_WC + FUSED                # 184  [HIDDEN, HIDDEN]
R_W3 = R_W2 + HIDDEN               # 216  [HIDDEN, HIDDEN]
R_WOUT = R_W3 + HIDDEN             # 248  [HIDDEN, ACT]
R_BIAS = R_WOUT + HIDDEN           # 280  9 rows: b_in, b1, g1, be1, b2, g2, be2, b3, bout
SLAB_ROWS = ((R_BIAS + N_BIAS_ROWS + 7) // 8) * 8   # 296


def _cdiv(a, b):
    return -(-a // b)


def _round_up(a, m):
    return _cdiv(a, m) * m


def _tensorcores_per_device():
    """Heuristic: dual-TensorCore chips (megacore v4/v5p, v7x) want >=2 grid blocks."""
    try:
        kind = jax.devices()[0].device_kind.lower()
    except Exception:
        return 1
    return 2 if any(tag in kind for tag in ("v4", "v5p", "v7", "7x")) else 1


def _choose_tile(batch):
    """Batch tile: <= TB_MAX rows, multiple of 8 (or == batch for a single block),
    and a grid that is a multiple of the core count on dual-TC chips."""
    cores = _tensorcores_per_device()
    n_blocks = _cdiv(batch, TB_MAX)
    if cores > 1 and batch >= cores * 8:
        n_blocks = _round_up(max(n_blocks, cores), cores)
    if n_blocks <= 1:
        return batch                          # block == full array: always a legal shape
    return _round_up(_cdiv(batch, n_blocks), 8)


def _layernorm(x, gamma, beta):
    # Independent E[x] and E[x^2] reductions (var = E[x^2] - mu^2) -> XLU can issue both
    # back-to-back instead of reduce -> VPU -> reduce; rsqrt lands on the EUP slot.
    mu = jnp.mean(x, axis=-1, keepdims=True)
    ms = jnp.mean(x * x, axis=-1, keepdims=True)
    var = ms - mu * mu
    return (x - mu) * jax.lax.rsqrt(var + LN_EPS) * gamma + beta


# ------------------------------- kernel --------------------------------------
def qnetwork_kernel(state_ref, slab_ref, out_ref):
    f32 = jnp.float32
    state = state_ref[...]                                   # [TB, OBS]

    # Static views into the single weight slab (no extra DMA descriptors).
    w_in = slab_ref[R_WIN:R_WIN + OBS, :]                    # [OBS, FUSED]
    w_c = slab_ref[R_WC:R_WC + FUSED, :HIDDEN]               # [FUSED, HIDDEN]
    w2 = slab_ref[R_W2:R_W2 + HIDDEN, :HIDDEN]               # [HIDDEN, HIDDEN]
    w3 = slab_ref[R_W3:R_W3 + HIDDEN, :HIDDEN]               # [HIDDEN, HIDDEN]
    wout = slab_ref[R_WOUT:R_WOUT + HIDDEN, :ACT]            # [HIDDEN, ACT]

    b_in = slab_ref[R_BIAS + 0:R_BIAS + 1, :]                # [1, FUSED]
    b1 = slab_ref[R_BIAS + 1:R_BIAS + 2, :HIDDEN]
    g1 = slab_ref[R_BIAS + 2:R_BIAS + 3, :HIDDEN]
    be1 = slab_ref[R_BIAS + 3:R_BIAS + 4, :HIDDEN]
    b2 = slab_ref[R_BIAS + 4:R_BIAS + 5, :HIDDEN]
    g2 = slab_ref[R_BIAS + 5:R_BIAS + 6, :HIDDEN]
    be2 = slab_ref[R_BIAS + 6:R_BIAS + 7, :HIDDEN]
    b3 = slab_ref[R_BIAS + 7:R_BIAS + 8, :HIDDEN]
    bout = slab_ref[R_BIAS + 8:R_BIAS + 9, :ACT]

    # Fused input layer: conv-as-matmul (server cols) || task_fc (task cols), shared ReLU.
    h0 = jnp.maximum(jnp.dot(state, w_in, preferred_element_type=f32) + b_in, 0.0)  # [TB, 160]

    # Degenerate cross-attention (softmax over 1 key == 1) folded with fc1, then ln1 + ReLU.
    h = jnp.dot(h0, w_c, preferred_element_type=f32) + b1
    h = jnp.maximum(_layernorm(h, g1, be1), 0.0)

    # dropout: inference mode -> identity
    h = jnp.dot(h, w2, preferred_element_type=f32) + b2                              # fc2
    h = jnp.maximum(_layernorm(h, g2, be2), 0.0)

    h = jnp.maximum(jnp.dot(h, w3, preferred_element_type=f32) + b3, 0.0)            # fc3

    out_ref[...] = jnp.dot(h, wout, preferred_element_type=f32) + bout               # [TB, ACT]


# --------------------------- weight preparation -------------------------------
def build_conv_matmul(conv_w, conv_b):
    """Conv1d(2->16, k=1) + channel-major flatten expressed as a [2S, UNITS] matmul."""
    eye = jnp.eye(S, dtype=jnp.float32)                                 # [S, S]
    t0 = (eye[:, None, :] * conv_w[None, :, 0:1]).reshape(S, UNITS)     # remain channel
    t1 = (eye[:, None, :] * conv_w[None, :, 1:2]).reshape(S, UNITS)     # hop channel
    tc = jnp.concatenate([t0, t1], axis=0)                              # [2S, UNITS]
    cb = jnp.repeat(conv_b, S)                                          # [UNITS]
    return tc, cb


def prepare_packed_params(params):
    """Fold + pack ALL weights into a single f32 slab (done ONCE, off the hot path)."""
    f32 = jnp.float32
    tc, cb = build_conv_matmul(params["conv_w"], params["conv_b"])

    # Fused input matmul: block-diagonal [tc | 0 ; 0 | wt].
    W_in = jnp.zeros((OBS, FUSED), f32)
    W_in = W_in.at[:2 * S, :UNITS].set(tc)
    W_in = W_in.at[2 * S:, UNITS:].set(params["wt"])
    b_in = jnp.concatenate([cb, params["bt"]])                           # [FUSED]

    # Degenerate attention fold (exact): attn = x @ (wv@wo) + (bv@wo + bo); fold into fc1.
    Wvo = params["wv"] @ params["wo"]                                    # [UNITS, HIDDEN]
    bvo = params["bv"] @ params["wo"] + params["bo"]                     # [HIDDEN]
    Wvo1 = Wvo @ params["w1"]                                            # [UNITS, HIDDEN]
    b1_fold = bvo @ params["w1"] + params["b1"]                          # [HIDDEN]
    W_c = jnp.concatenate([Wvo1, params["w1"]], axis=0)                  # [FUSED, HIDDEN]

    slab = jnp.zeros((SLAB_ROWS, FUSED), f32)
    slab = slab.at[R_WIN:R_WIN + OBS, :].set(W_in)
    slab = slab.at[R_WC:R_WC + FUSED, :HIDDEN].set(W_c)
    slab = slab.at[R_W2:R_W2 + HIDDEN, :HIDDEN].set(params["w2"])
    slab = slab.at[R_W3:R_W3 + HIDDEN, :HIDDEN].set(params["w3"])
    slab = slab.at[R_WOUT:R_WOUT + HIDDEN, :ACT].set(params["wout"])

    slab = slab.at[R_BIAS + 0, :].set(b_in)
    slab = slab.at[R_BIAS + 1, :HIDDEN].set(b1_fold)
    slab = slab.at[R_BIAS + 2, :HIDDEN].set(params["g1"])
    slab = slab.at[R_BIAS + 3, :HIDDEN].set(params["be1"])
    slab = slab.at[R_BIAS + 4, :HIDDEN].set(params["b2"])
    slab = slab.at[R_BIAS + 5, :HIDDEN].set(params["g2"])
    slab = slab.at[R_BIAS + 6, :HIDDEN].set(params["be2"])
    slab = slab.at[R_BIAS + 7, :HIDDEN].set(params["b3"])
    slab = slab.at[R_BIAS + 8, :ACT].set(params["bout"])
    return slab


# ------------------------------- forward --------------------------------------
def qnetwork_forward(state, slab):
    B = state.shape[0]
    tb = _choose_tile(B)
    grid = (_cdiv(B, tb),)   # no wrapper-side pad / slice: Pallas masks the ragged edge block

    return pl.pallas_call(
        qnetwork_kernel,
        out_shape=jax.ShapeDtypeStruct((B, ACT), jnp.float32),
        grid_spec=pltpu.PrefetchScalarGridSpec(
            num_scalar_prefetch=0,
            grid=grid,
            in_specs=[
                pl.BlockSpec((tb, OBS), lambda i: (i, 0)),               # state: tiled over batch
                pl.BlockSpec((SLAB_ROWS, FUSED), lambda i: (0, 0)),      # weight slab: VMEM-resident
            ],
            out_specs=pl.BlockSpec((tb, ACT), lambda i: (i, 0)),
        ),
        compiler_params=pltpu.CompilerParams(
            dimension_semantics=("parallel",),   # batch blocks independent -> dual-TC sharding
            vmem_limit_bytes=32 * 1024 * 1024,   # ~8-10 MiB working set at TB=2048; ample headroom
        ),
    )(state, slab)


# ------------------------------ params / reference ----------------------------
def init_params(key):
    ks = jax.random.split(key, 20)

    def w(k, shape, scale):
        return jax.random.normal(k, shape, jnp.float32) * scale

    return dict(
        conv_w=w(ks[0], (CONV_OUT, 2), 0.3),     # Conv1d weight [out, in] (k=1 squeezed)
        conv_b=w(ks[1], (CONV_OUT,), 0.1),
        wt=w(ks[2], (4, HIDDEN), 0.3), bt=w(ks[3], (HIDDEN,), 0.05),
        # q/k projections exist in nn.MultiheadAttention but cancel exactly
        # (softmax over a single key == 1.0); kept for parameter parity.
        wq=w(ks[4], (HIDDEN, HIDDEN), 0.1), bq=w(ks[5], (HIDDEN,), 0.05),
        wk=w(ks[6], (UNITS, HIDDEN), 0.05), bk=w(ks[7], (HIDDEN,), 0.05),
        wv=w(ks[8], (UNITS, HIDDEN), 0.05), bv=w(ks[9], (HIDDEN,), 0.05),
        wo=w(ks[10], (HIDDEN, HIDDEN), 0.1), bo=w(ks[11], (HIDDEN,), 0.05),
        w1=w(ks[12], (HIDDEN, HIDDEN), 0.1), b1=w(ks[13], (HIDDEN,), 0.05),
        w2=w(ks[14], (HIDDEN, HIDDEN), 0.1), b2=w(ks[15], (HIDDEN,), 0.05),
        w3=w(ks[16], (HIDDEN, HIDDEN), 0.1), b3=w(ks[17], (HIDDEN,), 0.05),
        wout=w(ks[18], (HIDDEN, ACT), 0.1), bout=w(ks[19], (ACT,), 0.05),
        g1=jnp.ones((HIDDEN,), jnp.float32), be1=jnp.zeros((HIDDEN,), jnp.float32),
        g2=jnp.ones((HIDDEN,), jnp.float32), be2=jnp.zeros((HIDDEN,), jnp.float32),
    )


def reference_forward(state, params):
    """Pure-JAX reference mirroring the PyTorch forward (inference mode)."""
    B = state.shape[0]
    remain, hop, task = state[:, :S], state[:, S:2 * S], state[:, 2 * S:]
    feats = jnp.stack([remain, hop], axis=1)                                   # [B, 2, S]
    conv = jnp.einsum("bis,oi->bos", feats, params["conv_w"]) + params["conv_b"][None, :, None]
    x = jax.nn.relu(conv).reshape(B, -1)                                       # [B, UNITS]
    t = jax.nn.relu(task @ params["wt"] + params["bt"])                        # [B, HIDDEN]
    v = x @ params["wv"] + params["bv"]                                        # softmax over 1 key == 1
    attn = v @ params["wo"] + params["bo"]

    def ln(z, g, b):
        mu = z.mean(-1, keepdims=True)
        var = ((z - mu) ** 2).mean(-1, keepdims=True)
        return (z - mu) / jnp.sqrt(var + LN_EPS) * g + b

    h = jax.nn.relu(ln((attn + t) @ params["w1"] + params["b1"], params["g1"], params["be1"]))
    h = jax.nn.relu(ln(h @ params["w2"] + params["b2"], params["g2"], params["be2"]))
    h = jax.nn.relu(h @ params["w3"] + params["b3"])
    return h @ params["wout"] + params["bout"]


if __name__ == "__main__":
    key = jax.random.PRNGKey(0)
    pkey, xkey, xkey2 = jax.random.split(key, 3)
    params = init_params(pkey)
    slab = prepare_packed_params(params)          # weight folding + packing done ONCE

    # Small-batch (action-selection) path: single block, 2 input DMAs total.
    B = 2
    state = jax.random.normal(xkey, (B, OBS), jnp.float32)       # [2, 20]
    out = jax.block_until_ready(qnetwork_forward(state, slab))
    ref = reference_forward(state, params)
    assert out.shape == (B, ACT), out.shape
    assert jnp.allclose(out, ref, rtol=1e-3, atol=1e-3), (out, ref)

    # Larger, non-multiple batch exercises the multi-block grid + ragged edge block.
    B2 = 333
    state2 = jax.random.normal(xkey2, (B2, OBS), jnp.float32)
    out2 = jax.block_until_ready(qnetwork_forward(state2, slab))
    ref2 = reference_forward(state2, params)
    assert out2.shape == (B2, ACT), out2.shape
    assert jnp.allclose(out2, ref2, rtol=1e-3, atol=1e-3)

    print("KERNEL_OK")
</pallas_src>

<mosaic_0001>
module attributes {stable_mosaic.version = 11 : i64} {
  func.func @qnetwork_kernel(%arg0: i32, %arg1: memref<2x20xf32, #tpu.memory_space<vmem>>, %arg2: memref<296x160xf32, #tpu.memory_space<vmem>>, %arg3: memref<2x8xf32, #tpu.memory_space<vmem>>) attributes {dimension_semantics = [#tpu.dimension_semantics<parallel>], iteration_bounds = array<i64: 1>, scalar_prefetch = 0 : i64, scratch_operands = 0 : i64, tpu.core_type = #tpu.core_type<tc>, window_params = [{transform_indices = @transform_0, window_bounds = array<i64: 2, 20>}, {pipeline_mode = #tpu.pipeline_mode<synchronous>, transform_indices = @transform_1, window_bounds = array<i64: 296, 160>}, {transform_indices = @transform_2, window_bounds = array<i64: 2, 8>}]} {
    %c0 = arith.constant 0 : index
    %c0_0 = arith.constant 0 : index
    %0 = vector.load %arg1[%c0, %c0_0] : memref<2x20xf32, #tpu.memory_space<vmem>>, vector<2x20xf32>
    %c0_1 = arith.constant 0 : index
    %c0_2 = arith.constant 0 : index
    %1 = vector.load %arg2[%c0_1, %c0_2] : memref<296x160xf32, #tpu.memory_space<vmem>>, vector<20x160xf32>
    %c24 = arith.constant 24 : index
    %c0_3 = arith.constant 0 : index
    %2 = vector.load %arg2[%c24, %c0_3] : memref<296x160xf32, #tpu.memory_space<vmem>>, vector<160x32xf32>
    %c184 = arith.constant 184 : index
    %c0_4 = arith.constant 0 : index
    %3 = vector.load %arg2[%c184, %c0_4] : memref<296x160xf32, #tpu.memory_space<vmem>>, vector<32x32xf32>
    %c216 = arith.constant 216 : index
    %c0_5 = arith.constant 0 : index
    %4 = vector.load %arg2[%c216, %c0_5] : memref<296x160xf32, #tpu.memory_space<vmem>>, vector<32x32xf32>
    %c248 = arith.constant 248 : index
    %c0_6 = arith.constant 0 : index
    %5 = vector.load %arg2[%c248, %c0_6] : memref<296x160xf32, #tpu.memory_space<vmem>>, vector<32x8xf32>
    %c280 = arith.constant 280 : index
    %c0_7 = arith.constant 0 : index
    %6 = vector.load %arg2[%c280, %c0_7] : memref<296x160xf32, #tpu.memory_space<vmem>>, vector<1x160xf32>
    %c281 = arith.constant 281 : index
    %c0_8 = arith.constant 0 : index
    %7 = vector.load %arg2[%c281, %c0_8] : memref<296x160xf32, #tpu.memory_space<vmem>>, vector<1x32xf32>
    %c282 = arith.constant 282 : index
    %c0_9 = arith.constant 0 : index
    %8 = vector.load %arg2[%c282, %c0_9] : memref<296x160xf32, #tpu.memory_space<vmem>>, vector<1x32xf32>
    %c283 = arith.constant 283 : index
    %c0_10 = arith.constant 0 : index
    %9 = vector.load %arg2[%c283, %c0_10] : memref<296x160xf32, #tpu.memory_space<vmem>>, vector<1x32xf32>
    %c284 = arith.constant 284 : index
    %c0_11 = arith.constant 0 : index
    %10 = vector.load %arg2[%c284, %c0_11] : memref<296x160xf32, #tpu.memory_space<vmem>>, vector<1x32xf32>
    %c285 = arith.constant 285 : index
    %c0_12 = arith.constant 0 : index
    %11 = vector.load %arg2[%c285, %c0_12] : memref<296x160xf32, #tpu.memory_space<vmem>>, vector<1x32xf32>
    %c286 = arith.constant 286 : index
    %c0_13 = arith.constant 0 : index
    %12 = vector.load %arg2[%c286, %c0_13] : memref<296x160xf32, #tpu.memory_space<vmem>>, vector<1x32xf32>
    %c287 = arith.constant 287 : index
    %c0_14 = arith.constant 0 : index
    %13 = vector.load %arg2[%c287, %c0_14] : memref<296x160xf32, #tpu.memory_space<vmem>>, vector<1x32xf32>
    %c288 = arith.constant 288 : index
    %c0_15 = arith.constant 0 : index
    %14 = vector.load %arg2[%c288, %c0_15] : memref<296x160xf32, #tpu.memory_space<vmem>>, vector<1x8xf32>
    %cst = arith.constant dense<0.000000e+00> : vector<2x160xf32>
    %15 = tpu.matmul %0, %1, %cst {dimension_numbers = #tpu.dot_dimension_numbers<[1], [0], [0], [1], [0, 0, 1, 1], [], []>} : vector<2x20xf32>, vector<20x160xf32>, vector<2x160xf32> -> vector<2x160xf32>
    %16 = vector.broadcast %6 : vector<1x160xf32> to vector<2x160xf32>
    %17 = arith.addf %15, %16 : vector<2x160xf32>
    %cst_16 = arith.constant 0.000000e+00 : f32
    %18 = vector.broadcast %cst_16 : f32 to vector<2x160xf32>
    %19 = arith.maximumf %17, %18 : vector<2x160xf32>
    %cst_17 = arith.constant dense<0.000000e+00> : vector<2x32xf32>
    %20 = tpu.matmul %19, %2, %cst_17 {dimension_numbers = #tpu.dot_dimension_numbers<[1], [0], [0], [1], [0, 0, 1, 1], [], []>} : vector<2x160xf32>, vector<160x32xf32>, vector<2x32xf32> -> vector<2x32xf32>
    %21 = vector.broadcast %7 : vector<1x32xf32> to vector<2x32xf32>
    %22 = arith.addf %20, %21 : vector<2x32xf32>
    %cst_18 = arith.constant dense<0.000000e+00> : vector<2xf32>
    %23 = vector.multi_reduction <add>, %22, %cst_18 [1] : vector<2x32xf32> to vector<2xf32>
    %24 = vector.shape_cast %23 : vector<2xf32> to vector<2x1xf32>
    %cst_19 = arith.constant 3.200000e+01 : f32
    %25 = vector.broadcast %cst_19 : f32 to vector<2x1xf32>
    %26 = arith.divf %24, %25 : vector<2x1xf32>
    %27 = arith.mulf %22, %22 : vector<2x32xf32>
    %cst_20 = arith.constant dense<0.000000e+00> : vector<2xf32>
    %28 = vector.multi_reduction <add>, %27, %cst_20 [1] : vector<2x32xf32> to vector<2xf32>
    %29 = vector.shape_cast %28 : vector<2xf32> to vector<2x1xf32>
    %cst_21 = arith.constant 3.200000e+01 : f32
    %30 = vector.broadcast %cst_21 : f32 to vector<2x1xf32>
    %31 = arith.divf %29, %30 : vector<2x1xf32>
    %32 = arith.mulf %26, %26 : vector<2x1xf32>
    %33 = arith.subf %31, %32 : vector<2x1xf32>
    %34 = vector.broadcast %26 : vector<2x1xf32> to vector<2x32xf32>
    %35 = arith.subf %22, %34 : vector<2x32xf32>
    %cst_22 = arith.constant 9.99999974E-6 : f32
    %36 = vector.broadcast %cst_22 : f32 to vector<2x1xf32>
    %37 = arith.addf %33, %36 : vector<2x1xf32>
    %38 = math.rsqrt %37 : vector<2x1xf32>
    %39 = vector.broadcast %38 : vector<2x1xf32> to vector<2x32xf32>
    %40 = arith.mulf %35, %39 : vector<2x32xf32>
    %41 = vector.broadcast %8 : vector<1x32xf32> to vector<2x32xf32>
    %42 = arith.mulf %40, %41 : vector<2x32xf32>
    %43 = vector.broadcast %9 : vector<1x32xf32> to vector<2x32xf32>
    %44 = arith.addf %42, %43 : vector<2x32xf32>
    %cst_23 = arith.constant 0.000000e+00 : f32
    %45 = vector.broadcast %cst_23 : f32 to vector<2x32xf32>
    %46 = arith.maximumf %44, %45 : vector<2x32xf32>
    %cst_24 = arith.constant dense<0.000000e+00> : vector<2x32xf32>
    %47 = tpu.matmul %46, %3, %cst_24 {dimension_numbers = #tpu.dot_dimension_numbers<[1], [0], [0], [1], [0, 0, 1, 1], [], []>} : vector<2x32xf32>, vector<32x32xf32>, vector<2x32xf32> -> vector<2x32xf32>
    %48 = vector.broadcast %10 : vector<1x32xf32> to vector<2x32xf32>
    %49 = arith.addf %47, %48 : vector<2x32xf32>
    %cst_25 = arith.constant dense<0.000000e+00> : vector<2xf32>
    %50 = vector.multi_reduction <add>, %49, %cst_25 [1] : vector<2x32xf32> to vector<2xf32>
    %51 = vector.shape_cast %50 : vector<2xf32> to vector<2x1xf32>
    %cst_26 = arith.constant 3.200000e+01 : f32
    %52 = vector.broadcast %cst_26 : f32 to vector<2x1xf32>
    %53 = arith.divf %51, %52 : vector<2x1xf32>
    %54 = arith.mulf %49, %49 : vector<2x32xf32>
    %cst_27 = arith.constant dense<0.000000e+00> : vector<2xf32>
    %55 = vector.multi_reduction <add>, %54, %cst_27 [1] : vector<2x32xf32> to vector<2xf32>
    %56 = vector.shape_cast %55 : vector<2xf32> to vector<2x1xf32>
    %cst_28 = arith.constant 3.200000e+01 : f32
    %57 = vector.broadcast %cst_28 : f32 to vector<2x1xf32>
    %58 = arith.divf %56, %57 : vector<2x1xf32>
    %59 = arith.mulf %53, %53 : vector<2x1xf32>
    %60 = arith.subf %58, %59 : vector<2x1xf32>
    %61 = vector.broadcast %53 : vector<2x1xf32> to vector<2x32xf32>
    %62 = arith.subf %49, %61 : vector<2x32xf32>
    %cst_29 = arith.constant 9.99999974E-6 : f32
    %63 = vector.broadcast %cst_29 : f32 to vector<2x1xf32>
    %64 = arith.addf %60, %63 : vector<2x1xf32>
    %65 = math.rsqrt %64 : vector<2x1xf32>
    %66 = vector.broadcast %65 : vector<2x1xf32> to vector<2x32xf32>
    %67 = arith.mulf %62, %66 : vector<2x32xf32>
    %68 = vector.broadcast %11 : vector<1x32xf32> to vector<2x32xf32>
    %69 = arith.mulf %67, %68 : vector<2x32xf32>
    %70 = vector.broadcast %12 : vector<1x32xf32> to vector<2x32xf32>
    %71 = arith.addf %69, %70 : vector<2x32xf32>
    %cst_30 = arith.constant 0.000000e+00 : f32
    %72 = vector.broadcast %cst_30 : f32 to vector<2x32xf32>
    %73 = arith.maximumf %71, %72 : vector<2x32xf32>
    %cst_31 = arith.constant dense<0.000000e+00> : vector<2x32xf32>
    %74 = tpu.matmul %73, %4, %cst_31 {dimension_numbers = #tpu.dot_dimension_numbers<[1], [0], [0], [1], [0, 0, 1, 1], [], []>} : vector<2x32xf32>, vector<32x32xf32>, vector<2x32xf32> -> vector<2x32xf32>
    %75 = vector.broadcast %13 : vector<1x32xf32> to vector<2x32xf32>
    %76 = arith.addf %74, %75 : vector<2x32xf32>
    %cst_32 = arith.constant 0.000000e+00 : f32
    %77 = vector.broadcast %cst_32 : f32 to vector<2x32xf32>
    %78 = arith.maximumf %76, %77 : vector<2x32xf32>
    %cst_33 = arith.constant dense<0.000000e+00> : vector<2x8xf32>
    %79 = tpu.matmul %78, %5, %cst_33 {dimension_numbers = #tpu.dot_dimension_numbers<[1], [0], [0], [1], [0, 0, 1, 1], [], []>} : vector<2x32xf32>, vector<32x8xf32>, vector<2x8xf32> -> vector<2x8xf32>
    %80 = vector.broadcast %14 : vector<1x8xf32> to vector<2x8xf32>
    %81 = arith.addf %79, %80 : vector<2x8xf32>
    %c0_34 = arith.constant 0 : index
    %c0_35 = arith.constant 0 : index
    %82 = vector.load %arg3[%c0_34, %c0_35] : memref<2x8xf32, #tpu.memory_space<vmem>>, vector<2x8xf32>
    tpu.vector_store %arg3[%c0_34, %c0_35], %81 {strides = array<i32>} : memref<2x8xf32, #tpu.memory_space<vmem>>, vector<2x8xf32>,
    return
  }
  func.func @transform_0(%arg0: i32) -> (i32, i32) {
    %c0_i32 = arith.constant 0 : i32
    %c0_i32_0 = arith.constant 0 : i32
    return %arg0, %c0_i32 : i32, i32
  }
  func.func @transform_1(%arg0: i32) -> (i32, i32) {
    %c0_i32 = arith.constant 0 : i32
    %c0_i32_0 = arith.constant 0 : i32
    %c0_i32_1 = arith.constant 0 : i32
    return %c0_i32, %c0_i32_0 : i32, i32
  }
  func.func @transform_2(%arg0: i32) -> (i32, i32) {
    %c0_i32 = arith.constant 0 : i32
    %c0_i32_0 = arith.constant 0 : i32
    return %arg0, %c0_i32 : i32, i32
  }
}

</mosaic_0001>

<bundles_post_ra>
// kernel: tpu_custom_call.1
= control target key start
LH: loop header
LB: loop body
LE: loop exit
PB: predicated region body
PF: predicated region fallthrough
CT: control target
= control target key end

     0   :  { %v644_v5 = vmov 0.0   ;;  %vm76_vm0 = vcmask 1043456   ;;  %v645_v8 = vmov 0.0|0.0   ;;  %vm72_vm1 = vcmask 162816   ;;  %s852_s0 = inlined_call_operand.vmem [shape: f32[2,20], index: 0, kind: input, shape index: {}]   ;;  %s853_s1 = inlined_call_operand.vmem [shape: f32[296,160], index: 1, kind: input, shape index: {}]   ;;  %s854_s2 = inlined_call_operand.hbm [shape: f32[2,8], index: 2, kind: output, shape index: {}]  }
   0x1   :  { %v14_v0 = vld [vmem:[%s853_s1 + $0x8] sm:$0xff]  ;;  %v16_v1 = vld [vmem:[%s853_s1 + $0x18] sm:$0xff]  ;;  %v13_v2 = vld [vmem:[%s853_s1] sm:$0xff]  ;;  %147 = vmatprep.mubr.f32.mxu0 %v644_v5  ;;  %564 = vmatprep.subr.bf16.mxu1 %v645_v8 }
   0x2   :  { %v560_v3 = vpack.c.bf16 %v16_v1, %v14_v0  ;;  %v15_v4 = vld [vmem:[%s853_s1 + $0x10] sm:$0xff]  ;;  %v18_v7 = vld [vmem:[%s853_s1 + $0x28] sm:$0xf]  ;;  %v20_v10 = vld [vmem:[%s853_s1 + $0x40] sm:$0xff] }
   0x3   :  { %v562_v6 = vpack.c.bf16 %v15_v4, %v13_v2  ;;  %v19_v9 = vld [vmem:[%s853_s1 + $0x30] sm:$0xff]  ;;  %v22_v13 = vld [vmem:[%s853_s1 + $0x60] sm:$0xff] }
   0x4   :  { %561 = vmatprep.subr.bf16.mxu0 %v560_v3  ;;  %v565_v11 = vpack.c.bf16 %v20_v10, %v19_v9  ;;  %v21_v12 = vld [vmem:[%s853_s1 + $0x50] sm:$0xff]  ;;  %v17_v14 = vld [vmem:[%s853_s1 + $0x20] sm:$0xf] }
   0x5   :  { %563 = vmatpush1.bf16.msra.mxu0 %v562_v6  ;;  %v568_v15 = vpack.c.bf16 %v22_v13, %v21_v12  ;;  %v12_v16 = vld [vmem:[%s852_s0] sm:$0x3]  ;;  %v23_v17 = vld [vmem:[%s853_s1 + $0x70] sm:$0xff] }
   0x6   :  { %505 = vmatprep.subr.msk.mxu0 %vm76_vm0, %v18_v7  ;;  %566 = vmatpush1.bf16.msra.mxu1 %v565_v11  ;;  %v24_v18 = vld [vmem:[%s853_s1 + $0x80] sm:$0xff] }
   0x7   :  { %567 = vmatprep.subr.bf16.mxu1 %v645_v8 }
   0x9   :  { %506 = vmatpush1.msk.msra.mxu0 %vm76_vm0, %v17_v14 }
   0xa   :  { %7 = vsyncpa [#allocation3], 0  ;;  %507 = vmatmul.mubr.msk.f32.vlgmr.msra.gmra.mrb[0].mxu0 %vm72_vm1, %v12_v16  ;;  %569 = vmatpush1.bf16.msra.mxu1 %v568_v15  ;;  %v571_v19 = vpack.c.bf16 %v24_v18, %v23_v17  ;;  %v25_v20 = vld [vmem:[%s853_s1 + $0x90] sm:$0xff]  ;;  %v26_v21 = vld [vmem:[%s853_s1 + $0xa0] sm:$0xff]  ;;  %v62_v41 = vlaneseq  ;;  %vm156_vm2 = vcmask 261120   ;;  %vm230_vm3 = vcmask 254976  }
   0xb   :  { %570 = vmatprep.subr.bf16.mxu1 %v645_v8  ;;  %594 = vmatprep.subr.bf16.mxu0 %v645_v8  ;;  %v574_v22 = vpack.c.bf16 %v26_v21, %v25_v20  ;;  %v27_v23 = vld [vmem:[%s853_s1 + $0xb0] sm:$0xff]  ;;  %v28_v24 = vld [vmem:[%s853_s1 + $0xc0] sm:$0xff]  ;;  %vm646_vm4 = vmmov 0   ;;  %s647_s18 = smov [#allocation2]   ;;  %vm488_vm5 = vcmask 58368  }
   0xc   :  { %v577_v25 = vpack.c.bf16 %v28_v24, %v27_v23  ;;  %v29_v26 = vld [vmem:[%s853_s1 + $0xd0] sm:$0xff]  ;;  %v30_v27 = vld [vmem:[%s853_s1 + $0xe0] sm:$0xff]  ;;  %v63_v42 = vshrl.u32 %v62_v41, 7  ;;  %535 = vmatprep.mubr.msk.f32.mxu0 %vm646_vm4, %v644_v5  ;;  %s496_s19 = sshll.u32 %s647_s18, 4  ;;  %s497_s19 = int_to_ptr.vmem [resolvable:$true] %s496_s19 }
   0xd   :  { %v580_v28 = vpack.c.bf16 %v30_v27, %v29_v26  ;;  %v31_v29 = vld [vmem:[%s853_s1 + $0xf0] sm:$0xff]  ;;  %v32_v30 = vld [vmem:[%s853_s1 + $0x100] sm:$0xff]  ;;  %s620_s20 = scalar_lea.vmem %s497_s19, 32  ;;  %p625_p1 = scmp.lt.s32.totalorder %s497_s19, %s497_s19 }
   0xe   :  { %572 = vmatpush1.bf16.msra.mxu1 %v571_v19  ;;  %v583_v31 = vpack.c.bf16 %v32_v30, %v31_v29  ;;  %v33_v32 = vld [vmem:[%s853_s1 + $0x110] sm:$0xff]  ;;  %v34_v33 = vld [vmem:[%s853_s1 + $0x120] sm:$0xff]  ;;  %v64_v43 = vsub.s32 0, %v63_v42  ;;  %v68_v45 = vsub.s32 1, %v63_v42  ;;  %p621_p0 = scmp.ne.s32.totalorder %s497_s19, %s620_s20  ;;  %p626_p2 = scmp.lt.s32.totalorder %s620_s20, %s620_s20 }
   0xf   :  { %573 = vmatprep.subr.bf16.mxu1 %v645_v8  ;;  %v586_v34 = vpack.c.bf16 %v34_v33, %v33_v32  ;;  %v35_v35 = vld [vmem:[%s853_s1 + $0x130] sm:$0xff]  ;;  %v36_v36 = vld [vmem:[%s853_s1 + $0x140] sm:$0xff] }
  0x10   :  { %v589_v37 = vpack.c.bf16 %v36_v36, %v35_v35  ;;  %v37_v38 = vld [vmem:[%s853_s1 + $0x150] sm:$0xff]  ;;  %v38_v39 = vld [vmem:[%s853_s1 + $0x160] sm:$0xff]  ;;  %p627_p3 = por %p626_p2, %p625_p1 }
  0x11   :  { %v592_v40 = vpack.c.bf16 %v38_v39, %v37_v38  ;;  %v504_v44 = vld [vmem:[%s853_s1 + $0x230] ss:$8 sm:$0x3]  ;;  %v53_v54 = vld [vmem:[%s853_s1 + $0x231] ss:$0 sm:$0xff]  ;;  %v40_v62 = vld [vmem:[%s853_s1 + $0x180] sm:$0xff] }
  0x12   :  { %575 = vmatpush1.bf16.msra.mxu1 %v574_v22  ;;  %v65_v46 = vrot.slane %v504_v44, %v64_v43  ;;  %v69_v47 = vrot.slane %v504_v44, %v68_v45  ;;  %v39_v61 = vld [vmem:[%s853_s1 + $0x170] sm:$0xff]  ;;  %v42_v1 = vld [vmem:[%s853_s1 + $0x1a0] sm:$0xff]  ;;  %p628_p4 = pnand %p627_p3, %p621_p0 }
  0x13   :  { %576 = vmatprep.subr.bf16.mxu1 %v645_v8  ;;  %v595_v63 = vpack.c.bf16 %v40_v62, %v39_v61  ;;  %v41_v0 = vld [vmem:[%s853_s1 + $0x190] sm:$0xff] }
  0x14   :  { %v598_v2 = vpack.c.bf16 %v42_v1, %v41_v0  ;;  %v54_v14 = vld [vmem:[%s853_s1 + $0x232] ss:$0 sm:$0xff]  ;;  %v55_v16 = vld [vmem:[%s853_s1 + $0x233] ss:$0 sm:$0xff]  ;;  %v56_v20 = vld [vmem:[%s853_s1 + $0x234] ss:$0 sm:$0xff] }
  0x15   :  { %596 = vmatpush3.bf16.msra.mxu0 %v595_v63  ;;  %v43_v27 = vld [vmem:[%s853_s1 + $0x1b0] sm:$0xff] }
  0x16   :  { %578 = vmatpush1.bf16.msra.mxu1 %v577_v25  ;;  %597 = vmatprep.subr.bf16.mxu0 %v645_v8  ;;  %v45_v30 = vld [vmem:[%s853_s1 + $0x1d0] sm:$0xff] }
  0x17   :  { %579 = vmatprep.subr.bf16.mxu1 %v645_v8  ;;  %v57_v42 = vld [vmem:[%s853_s1 + $0x235] ss:$0 sm:$0xff]  ;;  %v58_v44 = vld [vmem:[%s853_s1 + $0x236] ss:$0 sm:$0xff] }
  0x19   :  { %599 = vmatpush3.bf16.msra.mxu0 %v598_v2 }
  0x1a   :  { %581 = vmatpush1.bf16.msra.mxu1 %v580_v28  ;;  %600 = vmatprep.subr.bf16.mxu0 %v645_v8  ;;  %v44_v28 = vld [vmem:[%s853_s1 + $0x1c0] sm:$0xff] }
  0x1b   :  { %582 = vmatprep.subr.bf16.mxu1 %v645_v8  ;;  %v601_v29 = vpack.c.bf16 %v44_v28, %v43_v27 }
  0x1e   :  { %584 = vmatpush1.bf16.msra.mxu1 %v583_v31  ;;  %v46_v31 = vld [vmem:[%s853_s1 + $0x1e0] sm:$0xff] }
  0x1f   :  { %585 = vmatprep.subr.bf16.mxu1 %v645_v8  ;;  %v604_v32 = vpack.c.bf16 %v46_v31, %v45_v30 }
  0x22   :  { %587 = vmatpush1.bf16.msra.mxu1 %v586_v34 }
  0x23   :  { %588 = vmatprep.subr.bf16.mxu1 %v645_v8 }
  0x26   :  { %590 = vmatpush1.bf16.msra.mxu1 %v589_v37 }
  0x27   :  { %591 = vmatprep.subr.bf16.mxu1 %v645_v8 }
  0x2a   :  { %593 = vmatpush1.bf16.msra.mxu1 %v592_v40 }
  0xdd   :  { %v149_v48 = vpop.f32.mrb[0].mxu0 }
  0xde   :  { %v150_v49 = vadd.f32 %v149_v48, %v65_v46  ;;  %v151_v50 = vpop.f32.mrb[1].mxu0  ;;  %v47_v46 = vld [vmem:[%s853_s1 + $0x1f0] sm:$0xff] }
  0xdf   :  { %v152_v51 = vadd.f32 %v151_v50, %v69_v47  ;;  %v48_v47 = vld [vmem:[%s853_s1 + $0x200] sm:$0xff] }
  0xe0   :  { %v154_v53 = vmax.f32 %v150_v49, 0.0  ;;  %v607_v49 = vpack.c.bf16 %v48_v47, %v47_v46 }
  0xe1   :  { %v155_v52 = vmax.f32 %v152_v51, 0.0  ;;  %v49_v51 = vld [vmem:[%s853_s1 + $0x210] sm:$0xff] }
  0xe3   :  { %508 = vmatprep.mubr.msk.f32.mxu1 %vm156_vm2, %v155_v52  ;;  %v50_v52 = vld [vmem:[%s853_s1 + $0x220] sm:$0xff] }
  0xe4   :  { %225 = vmatmul.mubr.f32.vlgmr.msra.gmra.mrb[0].mxu1 %v154_v53  ;;  %v610_v53 = vpack.c.bf16 %v50_v52, %v49_v51 }
 0x1b7   :  { %v226_v55 = vpop.f32.mrb[0].mxu1 }
 0x1b8   :  { %v227_v56 = vadd.f32 %v226_v55, %v53_v54  ;;  %v228_v57 = vpop.f32.mrb[1].mxu1  ;;  %v59_v54 = vld [vmem:[%s853_s1 + $0x237] ss:$0 sm:$0xff] }
 0x1ba   :  { %v231_v58 = vsel %vm230_vm3, %v227_v56, 0.0  ;;  %v236_v59 = vmul.f32 %v227_v56, %v227_v56 }
 0x1bb   :  { %232 = vadd.xlane.f32.xlu0 %v231_v58 }
 0x1bc   :  { %v237_v60 = vsel %vm230_vm3, %v236_v59, 0.0 }
 0x1bf   :  { %238 = vadd.xlane.f32.xlu0 %v237_v60 }
 0x248   :  { %v233_v3 = vpop.xlane.xlu0 %232 }
 0x249   :  { %v235_v4 = vmul.f32 0.03125, %v233_v3 }
 0x24b   :  { %v241_v7 = vmul.f32 %v235_v4, %v235_v4  ;;  %v243_v12 = vsub.f32 %v227_v56, %v235_v4 }
 0x24c   :  { %v239_v6 = vpop.xlane.xlu0 %238 }
 0x24d   :  { %v240_v9 = vmul.f32 0.03125, %v239_v6 }
 0x24f   :  { %v242_v10 = vsub.f32 %v240_v9, %v241_v7 }
 0x251   :  { %v244_v11 = vadd.f32 1e-05, %v242_v10 }
 0x253   :  { %616 = vrsqrt.f32 %v244_v11 }
 0x25d   :  { %v617_v13 = vpop.eup %616 }
 0x25e   :  { %v246_v15 = vmul.f32 %v617_v13, %v243_v12 }
 0x260   :  { %v247_v17 = vmul.f32 %v246_v15, %v54_v14 }
 0x262   :  { %v248_v18 = vadd.f32 %v247_v17, %v55_v16 }
 0x264   :  { %v249_v19 = vmax.f32 %v248_v18, 0.0 }
 0x266   :  { %536 = vmatmul.mubr.msk.f32.vlgmr.msra.gmra.mrb[2].mxu0 %vm156_vm2, %v249_v19 }
 0x267   :  { %546 = vmatprep.mubr.msk.f32.mxu0 %vm646_vm4, %v644_v5  ;;  %602 = vmatpush3.bf16.msra.mxu0 %v601_v29 }
 0x268   :  { %603 = vmatprep.subr.bf16.mxu0 %v645_v8 }
 0x26b   :  { %605 = vmatpush3.bf16.msra.mxu0 %v604_v32 }
 0x26c   :  { %606 = vmatprep.subr.bf16.mxu0 %v645_v8 }
 0x339   :  { %v319_v21 = vpop.f32.mrb[2].mxu0 }
 0x33a   :  { %v320_v22 = vadd.f32 %v319_v21, %v56_v20  ;;  %v537_v23 = vpop.f32.mrb[3].mxu0 }
 0x33c   :  { %v323_v24 = vsel %vm230_vm3, %v320_v22, 0.0  ;;  %v327_v25 = vmul.f32 %v320_v22, %v320_v22 }
 0x33d   :  { %324 = vadd.xlane.f32.xlu1 %v323_v24 }
 0x33e   :  { %v328_v26 = vsel %vm230_vm3, %v327_v25, 0.0 }
 0x341   :  { %329 = vadd.xlane.f32.xlu1 %v328_v26 }
 0x3ca   :  { %v325_v33 = vpop.xlane.xlu1 %324 }
 0x3cb   :  { %v326_v34 = vmul.f32 0.03125, %v325_v33 }
 0x3cd   :  { %v332_v36 = vmul.f32 %v326_v34, %v326_v34  ;;  %v334_v40 = vsub.f32 %v320_v22, %v326_v34 }
 0x3ce   :  { %v330_v35 = vpop.xlane.xlu1 %329 }
 0x3cf   :  { %v331_v37 = vmul.f32 0.03125, %v330_v35 }
 0x3d1   :  { %v333_v38 = vsub.f32 %v331_v37, %v332_v36 }
 0x3d3   :  { %v335_v39 = vadd.f32 1e-05, %v333_v38 }
 0x3d5   :  { %618 = vrsqrt.f32 %v335_v39 }
 0x3df   :  { %v619_v41 = vpop.eup %618 }
 0x3e0   :  { %v337_v43 = vmul.f32 %v619_v41, %v334_v40 }
 0x3e2   :  { %v338_v45 = vmul.f32 %v337_v43, %v57_v42 }
 0x3e4   :  { %v339_v48 = vadd.f32 %v338_v45, %v58_v44 }
 0x3e6   :  { %v340_v50 = vmax.f32 %v339_v48, 0.0 }
 0x3e8   :  { %547 = vmatmul.mubr.msk.f32.vlgmr.msra.gmra.mrb[4].mxu0 %vm156_vm2, %v340_v50 }
 0x3e9   :  { %608 = vmatpush3.bf16.msra.mxu0 %v607_v49  ;;  %557 = vmatprep.mubr.msk.f32.mxu0 %vm646_vm4, %v644_v5 }
 0x3ea   :  { %609 = vmatprep.subr.bf16.mxu0 %v645_v8  ;;  %v60_v8 = vld [vmem:[%s853_s1 + $0x240] ss:$0 sm:$0xff] }
 0x3ed   :  { %611 = vmatpush3.bf16.msra.mxu0 %v610_v53 }
 0x4bb   :  { %v410_v55 = vpop.f32.mrb[4].mxu0 }
 0x4bc   :  { %v411_v56 = vadd.f32 %v410_v55, %v59_v54  ;;  %v548_v57 = vpop.f32.mrb[5].mxu0 }
 0x4be   :  { %v414_v5 = vmax.f32 %v411_v56, 0.0 }
 0x4c0   :  { %558 = vmatmul.mubr.msk.f32.vlgmr.msra.gmra.mrb[6].mxu0 %vm156_vm2, %v414_v5 }
 0x593   :  { %v484_v58 = vpop.f32.mrb[6].mxu0 }
 0x594   :  { %v485_v59 = vadd.f32 %v484_v58, %v60_v8  ;;  %v559_v60 = vpop.f32.mrb[7].mxu0 }
 0x596   :  { %489 = vst.msk [vmem:[#allocation2] sm:$0x3] %vm488_vm5, %v485_v59 }
 0x597   :  { %631 = shalt.err (!%p628_p4)
}
 0x598   :  { %s632_s23 = scalar_lea.hbm %s854_s2, 32 }
 0x599   :  { %p633_p5 = scmp.ne.s32.totalorder %s854_s2, %s632_s23  ;;  %p636_p6 = scmp.lt.u32.totalorder %s632_s23, %s854_s2 }
 0x59b   :  { %p638_p7 = pnand %p636_p6, %p633_p5 }
 0x59d   :  { %641 = shalt.err (!%p638_p7)
}
 0x59e   :  { %499 = dma.vmem_to_hbm [thread:$0]  %s497_s19, 32, %s854_s2, [#allocation3]  }
 0x59f   :  { %642 = dma.done.wait [#allocation3], 32  }
 0x5a0   :  { %643 = vsyncadd [#allocation3], 4294967264 }
 0x5a1   :  { %503 = vsyncpa [#allocation3], 1 }

</bundles_post_ra>
